<compile_context>
chip_gen: v5e
topology: v5e:2x2
jax: 0.10.0
libtpu: 0.0.40
codegen_flags: <defaults>
</compile_context>

<pallas_src>
import math
import functools

import jax
import jax.numpy as jnp
from jax.experimental import pallas as pl
from jax.experimental.pallas import tpu as pltpu


def _attention_kernel(k_ref, q_ref, wk_ref, bk_ref, wq_ref, bq_ref,
                      wp_ref, bp_ref, out_ref, score_ref,
                      *, n_head, hidden_dim):
    """One grid step = B batch elements; all heads handled in-body."""
    B, k_len, embed_dim = k_ref.shape
    q_len = q_ref.shape[1]
    out_dim = out_ref.shape[-1]

    # Flatten batch into the MXU M dimension for the projections (bf16 operands,
    # f32 accumulation).
    k2 = k_ref[...].reshape(B * k_len, embed_dim).astype(jnp.bfloat16)
    q2 = q_ref[...].reshape(B * q_len, embed_dim).astype(jnp.bfloat16)

    out_acc = jnp.zeros((B, q_len, out_dim), jnp.float32)
    attn_slabs = []

    for h in range(n_head):            # static, small loop — fully unrolled
        # Head-major weights: major-axis Ref loads, no lane-offset slicing.
        wk_h = wk_ref[h].astype(jnp.bfloat16)            # (E, hidden)
        wq_h = wq_ref[h].astype(jnp.bfloat16)

        kx = jnp.dot(k2, wk_h, preferred_element_type=jnp.float32) + bk_ref[h]
        qx = jnp.dot(q2, wq_h, preferred_element_type=jnp.float32) + bq_ref[h]

        kx3 = kx.reshape(B, k_len, hidden_dim)           # major-axis split
        qx3 = qx.reshape(B, q_len, hidden_dim)

        # dot_product score: contract over hidden, no explicit transpose.
        s = jnp.einsum("bqd,bkd->bqk",
                       qx3.astype(jnp.bfloat16), kx3.astype(jnp.bfloat16),
                       preferred_element_type=jnp.float32)   # (B, q_len, k_len)

        # Softmax in f32 (v5e has no bf16 VPU/EUP); exp -> EUP, recip -> EUP.
        s = s - jnp.max(s, axis=-1, keepdims=True)
        e = jnp.exp(s)
        attn = e * pl.reciprocal(jnp.sum(e, axis=-1, keepdims=True), approx=True)
        attn_slabs.append(attn)

        # attn @ kx (kx doubles as V), then this head's output projection slice,
        # accumulated — no lane concat of per-head slabs.
        av = jnp.einsum("bqk,bkd->bqd",
                        attn.astype(jnp.bfloat16), kx3.astype(jnp.bfloat16),
                        preferred_element_type=jnp.float32)   # (B, q_len, hidden)
        out_acc = out_acc + jnp.einsum(
            "bqd,do->bqo",
            av.astype(jnp.bfloat16), wp_ref[h].astype(jnp.bfloat16),
            preferred_element_type=jnp.float32)

    # Single full-block stores per grid step.
    out_ref[...] = (out_acc + bp_ref[...]).astype(out_ref.dtype)
    score_ref[...] = jnp.concatenate(attn_slabs, axis=-1).astype(score_ref.dtype)


def _pick_batch_block(mb, k_len, q_len, embed_dim, out_dim, n_head,
                      budget_bytes):
    """Largest divisor of mb whose double-buffered block footprint fits budget."""
    def footprint(B):
        per_elem = (B * k_len * embed_dim + B * q_len * embed_dim
                    + B * q_len * out_dim + B * q_len * n_head * k_len)
        return 2 * 4 * per_elem          # double-buffered f32 blocks
    for B in range(mb, 0, -1):
        if mb % B == 0 and footprint(B) <= budget_bytes:
            return B
    return 1


def attention_forward(k, q, params, *, n_head, hidden_dim,
                      batch_block=None, vmem_budget_bytes=8 << 20):
    """Mirrors Attention.forward (dot_product, dropout identity).

    Returns (output, score) with
      output: (mb, q_len, out_dim)
      score : (n_head * mb, q_len, k_len)
    """
    if k.ndim == 2:
        k = k[:, None, :]
    if q.ndim == 2:
        q = q[:, None, :]

    mb, k_len, embed_dim = k.shape
    q_len = q.shape[1]

    wk, bk = params["wk"], params["bk"]     # (H, E, D), (H, 1, D)
    wq, bq = params["wq"], params["bq"]     # (H, E, D), (H, 1, D)
    wp, bp = params["wp"], params["bp"]     # (H, D, out_dim), (1, out_dim)
    out_dim = wp.shape[-1]

    if batch_block is None:
        batch_block = _pick_batch_block(mb, k_len, q_len, embed_dim, out_dim,
                                        n_head, vmem_budget_bytes)
    B = batch_block
    assert mb % B == 0, "batch_block must divide the batch size"
    grid = (mb // B,)

    kernel = functools.partial(_attention_kernel, n_head=n_head,
                               hidden_dim=hidden_dim)

    # Note: the weight/bias blocks have constant index maps; on VMEM-tight
    # configs they could additionally be single-buffered via
    # pipeline_mode=pl.Buffered(1) — negligible at these sizes, so left default.
    in_specs = [
        pl.BlockSpec((B, k_len, embed_dim), lambda b: (b, 0, 0)),     # k
        pl.BlockSpec((B, q_len, embed_dim), lambda b: (b, 0, 0)),     # q
        pl.BlockSpec((n_head, embed_dim, hidden_dim), lambda b: (0, 0, 0)),  # wk
        pl.BlockSpec((n_head, 1, hidden_dim), lambda b: (0, 0, 0)),          # bk
        pl.BlockSpec((n_head, embed_dim, hidden_dim), lambda b: (0, 0, 0)),  # wq
        pl.BlockSpec((n_head, 1, hidden_dim), lambda b: (0, 0, 0)),          # bq
        pl.BlockSpec((n_head, hidden_dim, out_dim), lambda b: (0, 0, 0)),    # wp
        pl.BlockSpec((1, out_dim), lambda b: (0, 0)),                        # bp
    ]
    out_specs = (
        pl.BlockSpec((B, q_len, out_dim), lambda b: (b, 0, 0)),          # output
        pl.BlockSpec((B, q_len, n_head * k_len), lambda b: (b, 0, 0)),   # score slab
    )
    out_shape = (
        jax.ShapeDtypeStruct((mb, q_len, out_dim), jnp.float32),
        jax.ShapeDtypeStruct((mb, q_len, n_head * k_len), jnp.float32),
    )

    output, score_slab = pl.pallas_call(
        kernel,
        grid=grid,
        in_specs=in_specs,
        out_specs=out_specs,
        out_shape=out_shape,
        compiler_params=pltpu.CompilerParams(
            dimension_semantics=("parallel",)),   # shards batch across TCs on v7x
    )(k, q, wk, bk, wq, bq, wp, bp)

    # Wrapper-side layout plumbing only: module expects score indexed h*mb + b.
    score = (score_slab.reshape(mb, q_len, n_head, k_len)
             .transpose(2, 0, 1, 3)
             .reshape(n_head * mb, q_len, k_len))

    # TODO(synk): original module sets self.dropout = 0 (an int) and then calls
    # it; the intended nn.Dropout(0) is an identity, so nothing to do here.
    return output, score


def init_params(key, embed_dim, hidden_dim, n_head, out_dim):
    """nn.Linear-style init; stored head-major for the kernel."""
    ks = jax.random.split(key, 6)
    nhd = n_head * hidden_dim

    def lin(kw, kb, fan_in, fan_out):
        bound = 1.0 / math.sqrt(fan_in)
        w_t = jax.random.uniform(kw, (fan_in, fan_out), jnp.float32, -bound, bound)
        b = jax.random.uniform(kb, (fan_out,), jnp.float32, -bound, bound)
        return w_t, b

    wk_t, bk = lin(ks[0], ks[1], embed_dim, nhd)
    wq_t, bq = lin(ks[2], ks[3], embed_dim, nhd)
    wp_t, bp = lin(ks[4], ks[5], nhd, out_dim)

    return {
        "wk": wk_t.reshape(embed_dim, n_head, hidden_dim).transpose(1, 0, 2),
        "bk": bk.reshape(n_head, 1, hidden_dim),
        "wq": wq_t.reshape(embed_dim, n_head, hidden_dim).transpose(1, 0, 2),
        "bq": bq.reshape(n_head, 1, hidden_dim),
        "wp": wp_t.reshape(n_head, hidden_dim, out_dim),
        "bp": bp.reshape(1, out_dim),
    }


def reference_forward(k, q, params, *, n_head, hidden_dim):
    """Pure-JAX (f32) transcription of the PyTorch forward, for validation."""
    mb, k_len, embed_dim = k.shape
    q_len = q.shape[1]
    nhd = n_head * hidden_dim

    # Rebuild the fused torch-layout weights from the head-major params.
    wk = params["wk"].transpose(1, 0, 2).reshape(embed_dim, nhd)
    bk = params["bk"].reshape(nhd)
    wq = params["wq"].transpose(1, 0, 2).reshape(embed_dim, nhd)
    bq = params["bq"].reshape(nhd)
    wp = params["wp"].reshape(nhd, -1)
    bp = params["bp"].reshape(-1)

    kx = (k @ wk + bk).reshape(mb, k_len, n_head, hidden_dim)
    kx = kx.transpose(2, 0, 1, 3).reshape(-1, k_len, hidden_dim)
    qx = (q @ wq + bq).reshape(mb, q_len, n_head, hidden_dim)
    qx = qx.transpose(2, 0, 1, 3).reshape(-1, q_len, hidden_dim)
    score = jnp.einsum("bqd,bkd->bqk", qx, kx)
    score = jax.nn.softmax(score, axis=-1)
    out = jnp.einsum("bqk,bkd->bqd", score, kx)
    out = jnp.concatenate(jnp.split(out, n_head, axis=0), axis=-1)
    out = out @ wp + bp
    return out, score


if __name__ == "__main__":
    embed_dim = 32
    hidden_dim = 16
    n_head = 2
    out_dim = hidden_dim      # module default: out_dim = hidden_dim
    mb, q_len, k_len = 2, 8, 8

    key = jax.random.PRNGKey(0)
    pkey, kkey, qkey = jax.random.split(key, 3)
    params = init_params(pkey, embed_dim, hidden_dim, n_head, out_dim)

    k = jax.random.normal(kkey, (mb, k_len, embed_dim), jnp.float32)
    q = jax.random.normal(qkey, (mb, q_len, embed_dim), jnp.float32)

    fwd = functools.partial(attention_forward, n_head=n_head, hidden_dim=hidden_dim)
    out, score = jax.block_until_ready(fwd(k, q, params))

    ref_out, ref_score = reference_forward(k, q, params,
                                           n_head=n_head, hidden_dim=hidden_dim)
    assert out.shape == (mb, q_len, out_dim)
    assert score.shape == (n_head * mb, q_len, k_len)
    # bf16 MXU operands + approx reciprocal => loosened tolerances; f32
    # accumulation and f32 softmax bound the error.
    assert jnp.allclose(out, ref_out, atol=3e-2, rtol=3e-2), \
        float(jnp.max(jnp.abs(out - ref_out)))
    assert jnp.allclose(score, ref_score, atol=3e-2, rtol=3e-2), \
        float(jnp.max(jnp.abs(score - ref_score)))

    print("KERNEL_OK")
</pallas_src>

<mosaic_0001>
module attributes {stable_mosaic.version = 11 : i64} {
  func.func @_attention_kernel(%arg0: i32, %arg1: memref<2x8x32xf32, #tpu.memory_space<vmem>>, %arg2: memref<2x8x32xf32, #tpu.memory_space<vmem>>, %arg3: memref<2x32x16xf32, #tpu.memory_space<vmem>>, %arg4: memref<2x1x16xf32, #tpu.memory_space<vmem>>, %arg5: memref<2x32x16xf32, #tpu.memory_space<vmem>>, %arg6: memref<2x1x16xf32, #tpu.memory_space<vmem>>, %arg7: memref<2x16x16xf32, #tpu.memory_space<vmem>>, %arg8: memref<1x16xf32, #tpu.memory_space<vmem>>, %arg9: memref<2x8x16xf32, #tpu.memory_space<vmem>>, %arg10: memref<2x8x16xf32, #tpu.memory_space<vmem>>) attributes {dimension_semantics = [#tpu.dimension_semantics<parallel>], iteration_bounds = array<i64: 1>, scalar_prefetch = 0 : i64, scratch_operands = 0 : i64, tpu.core_type = #tpu.core_type<tc>, window_params = [{transform_indices = @transform_0, window_bounds = array<i64: 2, 8, 32>}, {transform_indices = @transform_1, window_bounds = array<i64: 2, 8, 32>}, {pipeline_mode = #tpu.pipeline_mode<synchronous>, transform_indices = @transform_2, window_bounds = array<i64: 2, 32, 16>}, {pipeline_mode = #tpu.pipeline_mode<synchronous>, transform_indices = @transform_3, window_bounds = array<i64: 2, 1, 16>}, {pipeline_mode = #tpu.pipeline_mode<synchronous>, transform_indices = @transform_4, window_bounds = array<i64: 2, 32, 16>}, {pipeline_mode = #tpu.pipeline_mode<synchronous>, transform_indices = @transform_5, window_bounds = array<i64: 2, 1, 16>}, {pipeline_mode = #tpu.pipeline_mode<synchronous>, transform_indices = @transform_6, window_bounds = array<i64: 2, 16, 16>}, {pipeline_mode = #tpu.pipeline_mode<synchronous>, transform_indices = @transform_7, window_bounds = array<i64: 1, 16>}, {transform_indices = @transform_8, window_bounds = array<i64: 2, 8, 16>}, {transform_indices = @transform_9, window_bounds = array<i64: 2, 8, 16>}]} {
    %c0 = arith.constant 0 : index
    %c0_0 = arith.constant 0 : index
    %c0_1 = arith.constant 0 : index
    %0 = vector.load %arg1[%c0, %c0_0, %c0_1] : memref<2x8x32xf32, #tpu.memory_space<vmem>>, vector<2x8x32xf32>
    %1 = vector.shape_cast %0 : vector<2x8x32xf32> to vector<16x32xf32>
    %2 = arith.truncf %1 : vector<16x32xf32> to vector<16x32xbf16>
    %c0_2 = arith.constant 0 : index
    %c0_3 = arith.constant 0 : index
    %c0_4 = arith.constant 0 : index
    %3 = vector.load %arg2[%c0_2, %c0_3, %c0_4] : memref<2x8x32xf32, #tpu.memory_space<vmem>>, vector<2x8x32xf32>
    %4 = vector.shape_cast %3 : vector<2x8x32xf32> to vector<16x32xf32>
    %5 = arith.truncf %4 : vector<16x32xf32> to vector<16x32xbf16>
    %cst = arith.constant 0.000000e+00 : f32
    %6 = vector.broadcast %cst : f32 to vector<2x8x16xf32>
    %c0_5 = arith.constant 0 : index
    %c0_6 = arith.constant 0 : index
    %c0_7 = arith.constant 0 : index
    %7 = vector.load %arg3[%c0_5, %c0_6, %c0_7] : memref<2x32x16xf32, #tpu.memory_space<vmem>>, vector<1x32x16xf32>
    %8 = vector.shape_cast %7 : vector<1x32x16xf32> to vector<32x16xf32>
    %9 = arith.truncf %8 : vector<32x16xf32> to vector<32x16xbf16>
    %c0_8 = arith.constant 0 : index
    %c0_9 = arith.constant 0 : index
    %c0_10 = arith.constant 0 : index
    %10 = vector.load %arg5[%c0_8, %c0_9, %c0_10] : memref<2x32x16xf32, #tpu.memory_space<vmem>>, vector<1x32x16xf32>
    %11 = vector.shape_cast %10 : vector<1x32x16xf32> to vector<32x16xf32>
    %12 = arith.truncf %11 : vector<32x16xf32> to vector<32x16xbf16>
    %cst_11 = arith.constant dense<0.000000e+00> : vector<16x16xf32>
    %13 = tpu.matmul %2, %9, %cst_11 {dimension_numbers = #tpu.dot_dimension_numbers<[1], [0], [0], [1], [0, 0, 1, 1], [], []>} : vector<16x32xbf16>, vector<32x16xbf16>, vector<16x16xf32> -> vector<16x16xf32>
    %c0_12 = arith.constant 0 : index
    %c0_13 = arith.constant 0 : index
    %c0_14 = arith.constant 0 : index
    %14 = vector.load %arg4[%c0_12, %c0_13, %c0_14] : memref<2x1x16xf32, #tpu.memory_space<vmem>>, vector<1x1x16xf32>
    %15 = vector.shape_cast %14 : vector<1x1x16xf32> to vector<1x16xf32>
    %16 = vector.broadcast %15 : vector<1x16xf32> to vector<16x16xf32>
    %17 = arith.addf %13, %16 : vector<16x16xf32>
    %cst_15 = arith.constant dense<0.000000e+00> : vector<16x16xf32>
    %18 = tpu.matmul %5, %12, %cst_15 {dimension_numbers = #tpu.dot_dimension_numbers<[1], [0], [0], [1], [0, 0, 1, 1], [], []>} : vector<16x32xbf16>, vector<32x16xbf16>, vector<16x16xf32> -> vector<16x16xf32>
    %c0_16 = arith.constant 0 : index
    %c0_17 = arith.constant 0 : index
    %c0_18 = arith.constant 0 : index
    %19 = vector.load %arg6[%c0_16, %c0_17, %c0_18] : memref<2x1x16xf32, #tpu.memory_space<vmem>>, vector<1x1x16xf32>
    %20 = vector.shape_cast %19 : vector<1x1x16xf32> to vector<1x16xf32>
    %21 = vector.broadcast %20 : vector<1x16xf32> to vector<16x16xf32>
    %22 = arith.addf %18, %21 : vector<16x16xf32>
    %23 = vector.shape_cast %17 : vector<16x16xf32> to vector<2x8x16xf32>
    %24 = vector.shape_cast %22 : vector<16x16xf32> to vector<2x8x16xf32>
    %25 = arith.truncf %24 : vector<2x8x16xf32> to vector<2x8x16xbf16>
    %26 = arith.truncf %23 : vector<2x8x16xf32> to vector<2x8x16xbf16>
    "tpu.trace_start"() <{level = 10 : i32, message = "bqd,bkd->bqk"}> : () -> ()
    %cst_19 = arith.constant dense<0.000000e+00> : vector<2x8x8xf32>
    %27 = tpu.matmul %25, %26, %cst_19 {dimension_numbers = #tpu.dot_dimension_numbers<[2], [2], [1], [1], [0, 0, 0, 1, 1, 1], [0], [0]>} : vector<2x8x16xbf16>, vector<2x8x16xbf16>, vector<2x8x8xf32> -> vector<2x8x8xf32>
    "tpu.trace_stop"() : () -> ()
    %cst_20 = arith.constant dense<0xFF800000> : vector<2x8xf32>
    %28 = vector.multi_reduction <maximumf>, %27, %cst_20 [2] : vector<2x8x8xf32> to vector<2x8xf32>
    %29 = vector.shape_cast %28 : vector<2x8xf32> to vector<2x8x1xf32>
    %30 = vector.broadcast %29 : vector<2x8x1xf32> to vector<2x8x8xf32>
    %31 = arith.subf %27, %30 : vector<2x8x8xf32>
    %32 = math.exp %31 : vector<2x8x8xf32>
    %cst_21 = arith.constant dense<0.000000e+00> : vector<2x8xf32>
    %33 = vector.multi_reduction <add>, %32, %cst_21 [2] : vector<2x8x8xf32> to vector<2x8xf32>
    %34 = vector.shape_cast %33 : vector<2x8xf32> to vector<2x8x1xf32>
    %35 = tpu.reciprocal %34 {approx = true} : vector<2x8x1xf32> -> vector<2x8x1xf32>
    %36 = vector.broadcast %35 : vector<2x8x1xf32> to vector<2x8x8xf32>
    %37 = arith.mulf %32, %36 : vector<2x8x8xf32>
    %38 = arith.truncf %37 : vector<2x8x8xf32> to vector<2x8x8xbf16>
    %39 = arith.truncf %23 : vector<2x8x16xf32> to vector<2x8x16xbf16>
    "tpu.trace_start"() <{level = 10 : i32, message = "bqk,bkd->bqd"}> : () -> ()
    %cst_22 = arith.constant dense<0.000000e+00> : vector<2x8x16xf32>
    %40 = tpu.matmul %38, %39, %cst_22 {dimension_numbers = #tpu.dot_dimension_numbers<[2], [1], [1], [2], [0, 0, 0, 1, 1, 2], [0], [0]>} : vector<2x8x8xbf16>, vector<2x8x16xbf16>, vector<2x8x16xf32> -> vector<2x8x16xf32>
    "tpu.trace_stop"() : () -> ()
    %41 = arith.truncf %40 : vector<2x8x16xf32> to vector<2x8x16xbf16>
    %c0_23 = arith.constant 0 : index
    %c0_24 = arith.constant 0 : index
    %c0_25 = arith.constant 0 : index
    %42 = vector.load %arg7[%c0_23, %c0_24, %c0_25] : memref<2x16x16xf32, #tpu.memory_space<vmem>>, vector<1x16x16xf32>
    %43 = vector.shape_cast %42 : vector<1x16x16xf32> to vector<16x16xf32>
    %44 = arith.truncf %43 : vector<16x16xf32> to vector<16x16xbf16>
    "tpu.trace_start"() <{level = 10 : i32, message = "bqd,do->bqo"}> : () -> ()
    %cst_26 = arith.constant dense<0.000000e+00> : vector<2x8x16xf32>
    %45 = tpu.matmul %41, %44, %cst_26 {dimension_numbers = #tpu.dot_dimension_numbers<[2], [0], [0, 1], [1], [0, 0, 0, 1, 1, 1], [], []>} : vector<2x8x16xbf16>, vector<16x16xbf16>, vector<2x8x16xf32> -> vector<2x8x16xf32>
    "tpu.trace_stop"() : () -> ()
    %46 = arith.addf %6, %45 : vector<2x8x16xf32>
    %c1 = arith.constant 1 : index
    %c0_27 = arith.constant 0 : index
    %c0_28 = arith.constant 0 : index
    %47 = vector.load %arg3[%c1, %c0_27, %c0_28] : memref<2x32x16xf32, #tpu.memory_space<vmem>>, vector<1x32x16xf32>
    %48 = vector.shape_cast %47 : vector<1x32x16xf32> to vector<32x16xf32>
    %49 = arith.truncf %48 : vector<32x16xf32> to vector<32x16xbf16>
    %c1_29 = arith.constant 1 : index
    %c0_30 = arith.constant 0 : index
    %c0_31 = arith.constant 0 : index
    %50 = vector.load %arg5[%c1_29, %c0_30, %c0_31] : memref<2x32x16xf32, #tpu.memory_space<vmem>>, vector<1x32x16xf32>
    %51 = vector.shape_cast %50 : vector<1x32x16xf32> to vector<32x16xf32>
    %52 = arith.truncf %51 : vector<32x16xf32> to vector<32x16xbf16>
    %cst_32 = arith.constant dense<0.000000e+00> : vector<16x16xf32>
    %53 = tpu.matmul %2, %49, %cst_32 {dimension_numbers = #tpu.dot_dimension_numbers<[1], [0], [0], [1], [0, 0, 1, 1], [], []>} : vector<16x32xbf16>, vector<32x16xbf16>, vector<16x16xf32> -> vector<16x16xf32>
    %c1_33 = arith.constant 1 : index
    %c0_34 = arith.constant 0 : index
    %c0_35 = arith.constant 0 : index
    %54 = vector.load %arg4[%c1_33, %c0_34, %c0_35] : memref<2x1x16xf32, #tpu.memory_space<vmem>>, vector<1x1x16xf32>
    %55 = vector.shape_cast %54 : vector<1x1x16xf32> to vector<1x16xf32>
    %56 = vector.broadcast %55 : vector<1x16xf32> to vector<16x16xf32>
    %57 = arith.addf %53, %56 : vector<16x16xf32>
    %cst_36 = arith.constant dense<0.000000e+00> : vector<16x16xf32>
    %58 = tpu.matmul %5, %52, %cst_36 {dimension_numbers = #tpu.dot_dimension_numbers<[1], [0], [0], [1], [0, 0, 1, 1], [], []>} : vector<16x32xbf16>, vector<32x16xbf16>, vector<16x16xf32> -> vector<16x16xf32>
    %c1_37 = arith.constant 1 : index
    %c0_38 = arith.constant 0 : index
    %c0_39 = arith.constant 0 : index
    %59 = vector.load %arg6[%c1_37, %c0_38, %c0_39] : memref<2x1x16xf32, #tpu.memory_space<vmem>>, vector<1x1x16xf32>
    %60 = vector.shape_cast %59 : vector<1x1x16xf32> to vector<1x16xf32>
    %61 = vector.broadcast %60 : vector<1x16xf32> to vector<16x16xf32>
    %62 = arith.addf %58, %61 : vector<16x16xf32>
    %63 = vector.shape_cast %57 : vector<16x16xf32> to vector<2x8x16xf32>
    %64 = vector.shape_cast %62 : vector<16x16xf32> to vector<2x8x16xf32>
    %65 = arith.truncf %64 : vector<2x8x16xf32> to vector<2x8x16xbf16>
    %66 = arith.truncf %63 : vector<2x8x16xf32> to vector<2x8x16xbf16>
    "tpu.trace_start"() <{level = 10 : i32, message = "bqd,bkd->bqk"}> : () -> ()
    %cst_40 = arith.constant dense<0.000000e+00> : vector<2x8x8xf32>
    %67 = tpu.matmul %65, %66, %cst_40 {dimension_numbers = #tpu.dot_dimension_numbers<[2], [2], [1], [1], [0, 0, 0, 1, 1, 1], [0], [0]>} : vector<2x8x16xbf16>, vector<2x8x16xbf16>, vector<2x8x8xf32> -> vector<2x8x8xf32>
    "tpu.trace_stop"() : () -> ()
    %cst_41 = arith.constant dense<0xFF800000> : vector<2x8xf32>
    %68 = vector.multi_reduction <maximumf>, %67, %cst_41 [2] : vector<2x8x8xf32> to vector<2x8xf32>
    %69 = vector.shape_cast %68 : vector<2x8xf32> to vector<2x8x1xf32>
    %70 = vector.broadcast %69 : vector<2x8x1xf32> to vector<2x8x8xf32>
    %71 = arith.subf %67, %70 : vector<2x8x8xf32>
    %72 = math.exp %71 : vector<2x8x8xf32>
    %cst_42 = arith.constant dense<0.000000e+00> : vector<2x8xf32>
    %73 = vector.multi_reduction <add>, %72, %cst_42 [2] : vector<2x8x8xf32> to vector<2x8xf32>
    %74 = vector.shape_cast %73 : vector<2x8xf32> to vector<2x8x1xf32>
    %75 = tpu.reciprocal %74 {approx = true} : vector<2x8x1xf32> -> vector<2x8x1xf32>
    %76 = vector.broadcast %75 : vector<2x8x1xf32> to vector<2x8x8xf32>
    %77 = arith.mulf %72, %76 : vector<2x8x8xf32>
    %78 = arith.truncf %77 : vector<2x8x8xf32> to vector<2x8x8xbf16>
    %79 = arith.truncf %63 : vector<2x8x16xf32> to vector<2x8x16xbf16>
    "tpu.trace_start"() <{level = 10 : i32, message = "bqk,bkd->bqd"}> : () -> ()
    %cst_43 = arith.constant dense<0.000000e+00> : vector<2x8x16xf32>
    %80 = tpu.matmul %78, %79, %cst_43 {dimension_numbers = #tpu.dot_dimension_numbers<[2], [1], [1], [2], [0, 0, 0, 1, 1, 2], [0], [0]>} : vector<2x8x8xbf16>, vector<2x8x16xbf16>, vector<2x8x16xf32> -> vector<2x8x16xf32>
    "tpu.trace_stop"() : () -> ()
    %81 = arith.truncf %80 : vector<2x8x16xf32> to vector<2x8x16xbf16>
    %c1_44 = arith.constant 1 : index
    %c0_45 = arith.constant 0 : index
    %c0_46 = arith.constant 0 : index
    %82 = vector.load %arg7[%c1_44, %c0_45, %c0_46] : memref<2x16x16xf32, #tpu.memory_space<vmem>>, vector<1x16x16xf32>
    %83 = vector.shape_cast %82 : vector<1x16x16xf32> to vector<16x16xf32>
    %84 = arith.truncf %83 : vector<16x16xf32> to vector<16x16xbf16>
    "tpu.trace_start"() <{level = 10 : i32, message = "bqd,do->bqo"}> : () -> ()
    %cst_47 = arith.constant dense<0.000000e+00> : vector<2x8x16xf32>
    %85 = tpu.matmul %81, %84, %cst_47 {dimension_numbers = #tpu.dot_dimension_numbers<[2], [0], [0, 1], [1], [0, 0, 0, 1, 1, 1], [], []>} : vector<2x8x16xbf16>, vector<16x16xbf16>, vector<2x8x16xf32> -> vector<2x8x16xf32>
    "tpu.trace_stop"() : () -> ()
    %86 = arith.addf %46, %85 : vector<2x8x16xf32>
    %c0_48 = arith.constant 0 : index
    %c0_49 = arith.constant 0 : index
    %87 = vector.load %arg8[%c0_48, %c0_49] : memref<1x16xf32, #tpu.memory_space<vmem>>, vector<1x16xf32>
    %88 = vector.shape_cast %87 : vector<1x16xf32> to vector<1x1x16xf32>
    %89 = vector.broadcast %88 : vector<1x1x16xf32> to vector<2x8x16xf32>
    %90 = arith.addf %86, %89 : vector<2x8x16xf32>
    %c0_50 = arith.constant 0 : index
    %c0_51 = arith.constant 0 : index
    %c0_52 = arith.constant 0 : index
    %91 = vector.load %arg9[%c0_50, %c0_51, %c0_52] : memref<2x8x16xf32, #tpu.memory_space<vmem>>, vector<2x8x16xf32>
    tpu.vector_store %arg9[%c0_50, %c0_51, %c0_52], %90 {strides = array<i32>} : memref<2x8x16xf32, #tpu.memory_space<vmem>>, vector<2x8x16xf32>,
    %92 = tpu.concatenate %37, %77 in 2 : vector<2x8x8xf32>, vector<2x8x8xf32> -> vector<2x8x16xf32>
    %c0_53 = arith.constant 0 : index
    %c0_54 = arith.constant 0 : index
    %c0_55 = arith.constant 0 : index
    %93 = vector.load %arg10[%c0_53, %c0_54, %c0_55] : memref<2x8x16xf32, #tpu.memory_space<vmem>>, vector<2x8x16xf32>
    tpu.vector_store %arg10[%c0_53, %c0_54, %c0_55], %92 {strides = array<i32>} : memref<2x8x16xf32, #tpu.memory_space<vmem>>, vector<2x8x16xf32>,
    return
  }
  func.func @transform_0(%arg0: i32) -> (i32, i32, i32) {
    %c0_i32 = arith.constant 0 : i32
    %c0_i32_0 = arith.constant 0 : i32
    %c0_i32_1 = arith.constant 0 : i32
    return %arg0, %c0_i32, %c0_i32_0 : i32, i32, i32
  }
  func.func @transform_1(%arg0: i32) -> (i32, i32, i32) {
    %c0_i32 = arith.constant 0 : i32
    %c0_i32_0 = arith.constant 0 : i32
    %c0_i32_1 = arith.constant 0 : i32
    return %arg0, %c0_i32, %c0_i32_0 : i32, i32, i32
  }
  func.func @transform_2(%arg0: i32) -> (i32, i32, i32) {
    %c0_i32 = arith.constant 0 : i32
    %c0_i32_0 = arith.constant 0 : i32
    %c0_i32_1 = arith.constant 0 : i32
    %c0_i32_2 = arith.constant 0 : i32
    return %c0_i32, %c0_i32_0, %c0_i32_1 : i32, i32, i32
  }
  func.func @transform_3(%arg0: i32) -> (i32, i32, i32) {
    %c0_i32 = arith.constant 0 : i32
    %c0_i32_0 = arith.constant 0 : i32
    %c0_i32_1 = arith.constant 0 : i32
    %c0_i32_2 = arith.constant 0 : i32
    return %c0_i32, %c0_i32_0, %c0_i32_1 : i32, i32, i32
  }
  func.func @transform_4(%arg0: i32) -> (i32, i32, i32) {
    %c0_i32 = arith.constant 0 : i32
    %c0_i32_0 = arith.constant 0 : i32
    %c0_i32_1 = arith.constant 0 : i32
    %c0_i32_2 = arith.constant 0 : i32
    return %c0_i32, %c0_i32_0, %c0_i32_1 : i32, i32, i32
  }
  func.func @transform_5(%arg0: i32) -> (i32, i32, i32) {
    %c0_i32 = arith.constant 0 : i32
    %c0_i32_0 = arith.constant 0 : i32
    %c0_i32_1 = arith.constant 0 : i32
    %c0_i32_2 = arith.constant 0 : i32
    return %c0_i32, %c0_i32_0, %c0_i32_1 : i32, i32, i32
  }
  func.func @transform_6(%arg0: i32) -> (i32, i32, i32) {
    %c0_i32 = arith.constant 0 : i32
    %c0_i32_0 = arith.constant 0 : i32
    %c0_i32_1 = arith.constant 0 : i32
    %c0_i32_2 = arith.constant 0 : i32
    return %c0_i32, %c0_i32_0, %c0_i32_1 : i32, i32, i32
  }
  func.func @transform_7(%arg0: i32) -> (i32, i32) {
    %c0_i32 = arith.constant 0 : i32
    %c0_i32_0 = arith.constant 0 : i32
    %c0_i32_1 = arith.constant 0 : i32
    return %c0_i32, %c0_i32_0 : i32, i32
  }
  func.func @transform_8(%arg0: i32) -> (i32, i32, i32) {
    %c0_i32 = arith.constant 0 : i32
    %c0_i32_0 = arith.constant 0 : i32
    %c0_i32_1 = arith.constant 0 : i32
    return %arg0, %c0_i32, %c0_i32_0 : i32, i32, i32
  }
  func.func @transform_9(%arg0: i32) -> (i32, i32, i32) {
    %c0_i32 = arith.constant 0 : i32
    %c0_i32_0 = arith.constant 0 : i32
    %c0_i32_1 = arith.constant 0 : i32
    return %arg0, %c0_i32, %c0_i32_0 : i32, i32, i32
  }
}

</mosaic_0001>

<bundles_post_ra>
// kernel: tpu_custom_call.1
= control target key start
LH: loop header
LB: loop body
LE: loop exit
PB: predicated region body
PF: predicated region fallthrough
CT: control target
= control target key end

     0   :  { %15 = vsyncpa [#allocation3], 0  ;;  %s765_s0 = inlined_call_operand.vmem [shape: f32[2,8,32], index: 0, kind: input, shape index: {}]   ;;  %s766_s1 = inlined_call_operand.vmem [shape: f32[2,8,32], index: 1, kind: input, shape index: {}]   ;;  %s767_s2 = inlined_call_operand.vmem [shape: f32[2,32,16], index: 2, kind: input, shape index: {}]   ;;  %s768_s3 = inlined_call_operand.vmem [shape: f32[2,1,16], index: 3, kind: input, shape index: {}]   ;;  %s769_s4 = inlined_call_operand.vmem [shape: f32[2,32,16], index: 4, kind: input, shape index: {}]   ;;  %s770_s5 = inlined_call_operand.vmem [shape: f32[2,1,16], index: 5, kind: input, shape index: {}]   ;;  %s771_s6 = inlined_call_operand.vmem [shape: f32[2,16,16], index: 6, kind: input, shape index: {}]   ;;  %s772_s7 = inlined_call_operand.vmem [shape: f32[1,16], index: 7, kind: input, shape index: {}]   ;;  %s773_s8 = inlined_call_operand.hbm [shape: f32[2,8,16], index: 8, kind: output, shape index: {0}]   ;;  %s774_s9 = inlined_call_operand.hbm [shape: f32[2,8,16], index: 9, kind: output, shape index: {1}]  }
   0x1   :  { %v42_v0 = vld [vmem:[%s767_s2 + $0x10] sm:$0xff]  ;;  %v43_v1 = vld [vmem:[%s767_s2 + $0x18] sm:$0xff]  ;;  %v40_v5 = vld [vmem:[%s767_s2] sm:$0xff] }
   0x2   :  { %v48_v2 = vld [vmem:[%s769_s4 + $0x10] sm:$0xff]  ;;  %v45_v3 = vpack.c.bf16 %v43_v1, %v42_v0  ;;  %v49_v4 = vld [vmem:[%s769_s4 + $0x18] sm:$0xff]  ;;  %v41_v6 = vld [vmem:[%s767_s2 + $0x8] sm:$0xff] }
   0x3   :  { %v51_v7 = vpack.c.bf16 %v49_v4, %v48_v2  ;;  %v46_v8 = vld [vmem:[%s769_s4] sm:$0xff]  ;;  %v47_v9 = vld [vmem:[%s769_s4 + $0x8] sm:$0xff]  ;;  %v44_v10 = vpack.c.bf16 %v41_v6, %v40_v5 }
   0x4   :  { %66 = vmatpush.bf16.msra.mxu0 %v45_v3  ;;  %v34_v11 = vld [vmem:[%s765_s0] sm:$0xff]  ;;  %v35_v12 = vld [vmem:[%s765_s0 + $0x8] sm:$0xff]  ;;  %v50_v14 = vpack.c.bf16 %v47_v9, %v46_v8 }
   0x5   :  { %v37_v13 = vld [vmem:[%s766_s1] sm:$0xff]  ;;  %87 = vmatpush.bf16.msra.mxu1 %v51_v7  ;;  %v38_v15 = vld [vmem:[%s766_s1 + $0x8] sm:$0xff]  ;;  %v36_v16 = vpack.c.bf16 %v35_v12, %v34_v11 }
   0x6   :  { %16 = vsyncpa [#allocation5], 0  ;;  %vm56_vm0 = vcmask 261120   ;;  %v39_v17 = vpack.c.bf16 %v38_v15, %v37_v13  ;;  %v495_v18 = vld [vmem:[%s768_s3] ss:$0 sm:$0xff]  ;;  %vm99_vm1 = vcmask 130048  }
   0x7   :  { %v496_v21 = vld [vmem:[%s770_s5] ss:$0 sm:$0xff]  ;;  %vm166_vm2 = vcmask 1043456   ;;  %v473_v36 = vld [vmem:[%s767_s2 + $0x30] sm:$0xff]  ;;  %v474_v37 = vld [vmem:[%s767_s2 + $0x38] sm:$0xff]  ;;  %vm138_vm3 = vcmask 64512  }
   0x8   :  { %67 = vmatpush.bf16.msra.mxu0 %v44_v10  ;;  %v471_v38 = vld [vmem:[%s767_s2 + $0x20] sm:$0xff]  ;;  %v211_v39 = vpack.c.bf16 %v474_v37, %v473_v36  ;;  %v472_v40 = vld [vmem:[%s767_s2 + $0x28] sm:$0xff]  ;;  %v477_v48 = vld [vmem:[%s769_s4 + $0x30] sm:$0xff]  ;;  %s568_s12 = smov 8   ;;  %s448_s19 = sshll.u32 %s774_s9, 4  ;;  %s449_s19 = int_to_ptr.hbm [resolvable:$true] %s448_s19 }
   0x9   :  { %88 = vmatpush.bf16.msra.mxu1 %v50_v14  ;;  %v210_v41 = vpack.c.bf16 %v472_v40, %v471_v38  ;;  %v478_v49 = vld [vmem:[%s769_s4 + $0x38] sm:$0xff]  ;;  %v475_v51 = vld [vmem:[%s769_s4 + $0x20] sm:$0xff]  ;;  %v476_v52 = vld [vmem:[%s769_s4 + $0x28] sm:$0xff]  ;;  %s570_s20 = smov 128   ;;  %s571_s23 = smov [#allocation2]  }
   0xa   :  { %v218_v50 = vpack.c.bf16 %v478_v49, %v477_v48  ;;  %v217_v53 = vpack.c.bf16 %v476_v52, %v475_v51  ;;  %v497_v57 = vld [vmem:[%s768_s3 + $0x1] ss:$0 sm:$0xff]  ;;  %s433_s2 = sshll.u32 %s571_s23, 4  ;;  %s435_s25 = sshll.u32 %s773_s8, 4  ;;  %s434_s2 = int_to_ptr.vmem [resolvable:$true] %s433_s2  ;;  %s436_s25 = int_to_ptr.hbm [resolvable:$true] %s435_s25 }
   0xb   :  { %465 = vmatmul.msk.bf16.vlgmr.msra.gmra.mxu0 %vm56_vm0, %v36_v16 }
   0xc   :  { %466 = vmatmul.msk.bf16.vlgmr.msra.gmra.mxu1 %vm56_vm0, %v39_v17 }
  0x88   :  { %v69_v19 = vpop.f32.mrf.mxu0 }
  0x89   :  { %v70_v20 = vadd.f32 %v495_v18, %v69_v19  ;;  %v90_v22 = vpop.f32.mrf.mxu1 }
  0x8a   :  { %v91_v24 = vadd.f32 %v496_v21, %v90_v22 }
  0x8b   :  { %v97_v23 = vpack.c.bf16 %v70_v20, %v70_v20 }
  0x8c   :  { %v95_v28 = vpack.c.bf16 %v91_v24, %v91_v24 }
  0x8d   :  { %v104_v25 = vsel %vm99_vm1, %v97_v23, 0  ;;  %v167_v26 = vsel %vm166_vm2, %v97_v23, 0 }
  0x8e   :  { %113 = vmatpush.bf16.xpose.msra.mxu2 %v104_v25  ;;  %176 = vmatpush.bf16.msrb.mxu0 %v167_v26  ;;  %v202_v26 = vld [vmem:[%s771_s6] sm:$0xff] }
  0x90   :  { %v71_v27 = vpop.f32.mrf.mxu0 }
  0x91   :  { %v72_v29 = vadd.f32 %v495_v18, %v71_v27  ;;  %v92_v31 = vpop.f32.mrf.mxu1  ;;  %v498_v18 = vld [vmem:[%s770_s5 + $0x1] ss:$0 sm:$0xff]  ;;  %v203_v27 = vld [vmem:[%s771_s6 + $0x8] sm:$0xff] }
  0x92   :  { %v93_v34 = vadd.f32 %v496_v21, %v92_v31 }
  0x93   :  { %v98_v30 = vpack.c.bf16 %v72_v29, %v72_v29 }
  0x94   :  { %v96_v35 = vpack.c.bf16 %v93_v34, %v93_v34 }
  0x95   :  { %467 = vmatmul.msk.bf16.vlgmr.msra.gmra.mxu2 %vm99_vm1, %v95_v28  ;;  %v123_v32 = vsel %vm99_vm1, %v98_v30, 0  ;;  %v185_v33 = vsel %vm166_vm2, %v98_v30, 0  ;;  %v204_v28 = vpack.c.bf16 %v203_v27, %v202_v26 }
  0x96   :  { %132 = vmatpush.bf16.xpose.msra.mxu3 %v123_v32  ;;  %194 = vmatpush.bf16.msrb.mxu1 %v185_v33 }
  0x97   :  { %230 = vmatpush.bf16.msrb.mxu2 %v211_v39 }
  0x9b   :  { %231 = vmatpush.bf16.msrb.mxu2 %v210_v41 }
  0x9d   :  { %468 = vmatmul.msk.bf16.vlgmr.msra.gmra.mxu3 %vm99_vm1, %v96_v35 }
  0x9e   :  { %249 = vmatpush.bf16.msrb.mxu3 %v218_v50 }
  0xa2   :  { %250 = vmatpush.bf16.msrb.mxu3 %v217_v53 }
  0xa5   :  { %480 = vmatmul.msk.bf16.vlgmr.msrb.gmra.mxu2 %vm56_vm0, %v36_v16 }
  0xad   :  { %482 = vmatmul.msk.bf16.vlgmr.msrb.gmra.mxu3 %vm56_vm0, %v39_v17 }
 0x118   :  { %v115_v42 = vpop.f32.mrf.mxu2 }
 0x119   :  { %v139_v43 = vsel %vm138_vm3, %v115_v42, -inf }
 0x11a   :  { %140 = vmax.xlane.f32.xlu0 %v139_v43 }
 0x120   :  { %v117_v44 = vpop.f32.mrf.mxu2  ;;  %v134_v45 = vpop.f32.mrf.mxu3 }
 0x121   :  { %v142_v46 = vsel %vm138_vm3, %v134_v45, -inf }
 0x122   :  { %143 = vmax.xlane.f32.xlu0 %v142_v46 }
 0x128   :  { %v136_v47 = vpop.f32.mrf.mxu3  ;;  %v233_v59 = vpop.f32.mrf.mxu2 }
 0x129   :  { %v234_v61 = vadd.f32 %v497_v57, %v233_v59 }
 0x12b   :  { %v259_v0 = vpack.c.bf16 %v234_v61, %v234_v61 }
 0x12d   :  { %v265_v2 = vsel %vm99_vm1, %v259_v0, 0  ;;  %v326_v3 = vsel %vm166_vm2, %v259_v0, 0  ;;  %v487_v0 = vld [vmem:[%s771_s6 + $0x10] sm:$0xff] }
 0x12e   :  { %274 = vmatpush.bf16.xpose.msra.mxu0 %v265_v2  ;;  %335 = vmatpush.bf16.msra.mxu2 %v326_v3 }
 0x130   :  { %v235_v6 = vpop.f32.mrf.mxu2  ;;  %v252_v19 = vpop.f32.mrf.mxu3 }
 0x131   :  { %v236_v7 = vadd.f32 %v497_v57, %v235_v6  ;;  %v253_v21 = vadd.f32 %v498_v18, %v252_v19 }
 0x133   :  { %v260_v8 = vpack.c.bf16 %v236_v7, %v236_v7  ;;  %v257_v22 = vpack.c.bf16 %v253_v21, %v253_v21 }
 0x135   :  { %v284_v9 = vsel %vm99_vm1, %v260_v8, 0  ;;  %v344_v10 = vsel %vm166_vm2, %v260_v8, 0 }
 0x136   :  { %293 = vmatpush.bf16.xpose.msra.mxu1 %v284_v9  ;;  %353 = vmatpush.bf16.msra.mxu3 %v344_v10 }
 0x138   :  { %v254_v23 = vpop.f32.mrf.mxu3 }
 0x139   :  { %v255_v24 = vadd.f32 %v498_v18, %v254_v23 }
 0x13b   :  { %v258_v25 = vpack.c.bf16 %v255_v24, %v255_v24 }
 0x18d   :  { %v141_v54 = vpop.xlane.xlu0 %140 }
 0x18e   :  { %v145_v55 = vsub.f32 %v115_v42, %v141_v54 }
 0x190   :  { %v147_v56 = vmul.f32 1.442695, %v145_v55 }
 0x192   :  { %500 = vpow2.f32 %v147_v56 }
 0x195   :  { %v144_v58 = vpop.xlane.xlu0 %143 }
 0x196   :  { %v146_v60 = vsub.f32 %v134_v45, %v144_v58 }
 0x198   :  { %v501_v62 = vpop.eup %500  ;;  %v149_v63 = vmul.f32 1.442695, %v146_v60 }
 0x199   :  { %v151_v1 = vsel %vm138_vm3, %v501_v62, 0.0 }
 0x19a   :  { %502 = vpow2.f32 %v149_v63  ;;  %152 = vadd.xlane.f32.xlu1 %v151_v1  ;;  %v488_v1 = vld [vmem:[%s771_s6 + $0x18] sm:$0xff]  ;;  %s569_s6 = smov [#allocation4]  }
 0x19b   :  { %v364_v2 = vpack.c.bf16 %v488_v1, %v487_v0  ;;  %s446_s16 = sshll.u32 %s569_s6, 4  ;;  %s447_s16 = int_to_ptr.vmem [resolvable:$true] %s446_s16 }
 0x1a0   :  { %v503_v4 = vpop.eup %502 }
 0x1a1   :  { %v154_v5 = vsel %vm138_vm3, %v503_v4, 0.0 }
 0x1a2   :  { %155 = vadd.xlane.f32.xlu1 %v154_v5 }
 0x20d   :  { %v153_v11 = vpop.xlane.xlu1 %152 }
 0x20e   :  { %504 = vrcp.f32 %v153_v11 }
 0x214   :  { %v505_v12 = vpop.eup %504 }
 0x215   :  { %v709_v13 = vmul.f32 %v505_v12, %v501_v62  ;;  %v156_v14 = vpop.xlane.xlu1 %155 }
 0x216   :  { %506 = vrcp.f32 %v156_v14 }
 0x217   :  { %v161_v15 = vpack.c.bf16 %v709_v13, %v709_v13 }
 0x219   :  { %469 = vmatmul.msk.bf16.vlgmr.msrb.gmra.mxu0 %vm138_vm3, %v161_v15  ;;  %v499_v15 = vld [vmem:[%s772_s7] ss:$0 sm:$0xff] }
 0x21a   :  { %380 = vmatpush.bf16.msrb.mxu0 %v364_v2 }
 0x21c   :  { %v507_v16 = vpop.eup %506 }
 0x21d   :  { %v714_v17 = vmul.f32 %v507_v16, %v503_v4 }
 0x21f   :  { %v162_v20 = vpack.c.bf16 %v714_v17, %v714_v17 }
 0x221   :  { %470 = vmatmul.msk.bf16.vlgmr.msrb.gmra.mxu1 %vm138_vm3, %v162_v20 }
 0x222   :  { %402 = vmatpush.bf16.msrb.mxu1 %v204_v28 }
 0x229   :  { %483 = vmatmul.msk.bf16.vlgmr.msra.gmra.mxu0 %vm99_vm1, %v257_v22 }
 0x231   :  { %484 = vmatmul.msk.bf16.vlgmr.msra.gmra.mxu1 %vm99_vm1, %v258_v25 }
 0x296   :  { %v178_v29 = vpop.f32.mrf.mxu0 }
 0x297   :  { %v200_v30 = vpack.c.bf16 %v178_v29, %v178_v29 }
 0x299   :  { %v389_v34 = vunpack.c.l.b16 %v200_v30 }
 0x29e   :  { %v180_v31 = vpop.f32.mrf.mxu0  ;;  %v196_v32 = vpop.f32.mrf.mxu1 }
 0x29f   :  { %v201_v33 = vpack.c.bf16 %v196_v32, %v196_v32 }
 0x2a1   :  { %v390_v35 = vunpack.c.l.b16 %v201_v33 }
 0x2a3   :  { %v391_v36 = vpack.c.b16 %v390_v35, %v389_v34 }
 0x2a5   :  { %490 = vmatmul.msk.bf16.vlgmr.msrb.gmra.mxu1 %vm99_vm1, %v391_v36 }
 0x2a6   :  { %v198_v37 = vpop.f32.mrf.mxu1  ;;  %v276_v38 = vpop.f32.mrf.mxu0 }
 0x2a7   :  { %v299_v39 = vsel %vm138_vm3, %v276_v38, -inf }
 0x2a8   :  { %300 = vmax.xlane.f32.xlu2 %v299_v39 }
 0x2ae   :  { %v278_v40 = vpop.f32.mrf.mxu0  ;;  %v295_v41 = vpop.f32.mrf.mxu1 }
 0x2af   :  { %v302_v42 = vsel %vm138_vm3, %v295_v41, -inf }
 0x2b0   :  { %303 = vmax.xlane.f32.xlu2 %v302_v42 }
 0x2b6   :  { %v297_v43 = vpop.f32.mrf.mxu1 }
 0x31b   :  { %v301_v44 = vpop.xlane.xlu2 %300 }
 0x31c   :  { %v305_v45 = vsub.f32 %v276_v38, %v301_v44 }
 0x31e   :  { %v307_v46 = vmul.f32 1.442695, %v305_v45 }
 0x320   :  { %508 = vpow2.f32 %v307_v46 }
 0x322   :  { %v404_v14 = vpop.f32.mrf.mxu1 }
 0x323   :  { %v304_v47 = vpop.xlane.xlu2 %303 }
 0x324   :  { %v306_v48 = vsub.f32 %v295_v41, %v304_v47 }
 0x326   :  { %v509_v49 = vpop.eup %508  ;;  %v309_v50 = vmul.f32 1.442695, %v306_v48 }
 0x327   :  { %v311_v51 = vsel %vm138_vm3, %v509_v49, 0.0 }
 0x328   :  { %510 = vpow2.f32 %v309_v50  ;;  %312 = vadd.xlane.f32.xlu0 %v311_v51 }
 0x32a   :  { %v406_v19 = vpop.f32.mrf.mxu1 }
 0x32e   :  { %v511_v52 = vpop.eup %510 }
 0x32f   :  { %v314_v53 = vsel %vm138_vm3, %v511_v52, 0.0 }
 0x330   :  { %315 = vadd.xlane.f32.xlu1 %v314_v53 }
 0x39b   :  { %v313_v54 = vpop.xlane.xlu0 %312 }
 0x39c   :  { %512 = vrcp.f32 %v313_v54 }
 0x3a2   :  { %v513_v55 = vpop.eup %512 }
 0x3a3   :  { %v316_v56 = vpop.xlane.xlu1 %315  ;;  %v319_v57 = vmul.f32 %v513_v55, %v509_v49 }
 0x3a4   :  { %514 = vrcp.f32 %v316_v56 }
 0x3a5   :  { %419 = vrot.lane.b32.xlu2 %v319_v57, %s568_s12  ;;  %v321_v58 = vpack.c.bf16 %v319_v57, %v319_v57 }
 0x3a7   :  { %485 = vmatmul.msk.bf16.vlgmr.msra.gmra.mxu2 %vm138_vm3, %v321_v58 }
 0x3aa   :  { %v515_v59 = vpop.eup %514 }
 0x3ab   :  { %v320_v60 = vmul.f32 %v515_v59, %v511_v52 }
 0x3ad   :  { %421 = vrot.lane.b32.xlu0 %v320_v60, %s568_s12  ;;  %v322_v61 = vpack.c.bf16 %v320_v60, %v320_v60 }
 0x3af   :  { %486 = vmatmul.msk.bf16.vlgmr.msra.gmra.mxu3 %vm138_vm3, %v322_v61 }
 0x3ff   :  { %v420_v62 = vpop.permute.xlu2 %419 }
 0x400   :  { %v425_v63 = vsel %vm138_vm3, %v709_v13, %v420_v62 }
 0x401   :  { %427 = vst.msk [vmem:[#allocation4] sm:$0xff] %vm99_vm1, %v425_v63 }
 0x41f   :  { %v422_v3 = vpop.permute.xlu0 %421 }
 0x420   :  { %v426_v4 = vsel %vm138_vm3, %v714_v17, %v422_v3 }
 0x421   :  { %428 = vst.msk [vmem:[#allocation4 + $0x8] sm:$0xff] %vm99_vm1, %v426_v4 }
 0x422   :  { %454 = dma.vmem_to_hbm [thread:$0]  %s447_s16, 256, %s449_s19, [#allocation5], %s570_s20, %s570_s20, %s568_s12  }
 0x42a   :  { %v337_v5 = vpop.f32.mrf.mxu2 }
 0x42b   :  { %v359_v6 = vpack.c.bf16 %v337_v5, %v337_v5 }
 0x42d   :  { %v367_v10 = vunpack.c.l.b16 %v359_v6 }
 0x432   :  { %v339_v7 = vpop.f32.mrf.mxu2  ;;  %v355_v8 = vpop.f32.mrf.mxu3 }
 0x433   :  { %v360_v9 = vpack.c.bf16 %v355_v8, %v355_v8 }
 0x435   :  { %v368_v11 = vunpack.c.l.b16 %v360_v9 }
 0x437   :  { %v369_v12 = vpack.c.b16 %v368_v11, %v367_v10 }
 0x439   :  { %489 = vmatmul.msk.bf16.vlgmr.msrb.gmra.mxu0 %vm99_vm1, %v369_v12 }
 0x43a   :  { %v357_v13 = vpop.f32.mrf.mxu3 }
 0x4b6   :  { %v382_v16 = vpop.f32.mrf.mxu0 }
 0x4b7   :  { %v405_v17 = vadd.f32 %v404_v14, %v382_v16 }
 0x4b9   :  { %v413_v18 = vadd.f32 %v499_v15, %v405_v17 }
 0x4bb   :  { %415 = vst.msk [vmem:[#allocation2] sm:$0xff] %vm99_vm1, %v413_v18 }
 0x4be   :  { %v384_v20 = vpop.f32.mrf.mxu0 }
 0x4bf   :  { %v407_v21 = vadd.f32 %v406_v19, %v384_v20 }
 0x4c1   :  { %v414_v22 = vadd.f32 %v499_v15, %v407_v21 }
 0x4c3   :  { %416 = vst.msk [vmem:[#allocation2 + $0x8] sm:$0xff] %vm99_vm1, %v414_v22 }
 0x4c4   :  { %441 = dma.vmem_to_hbm [thread:$0]  %s434_s2, 256, %s436_s25, [#allocation3], %s570_s20, %s570_s20, %s568_s12  }
 0x4c5   :  { %564 = dma.done.wait [#allocation3], 256  }
 0x4c6   :  { %565 = vsyncadd [#allocation3], 4294967040 }
 0x4c7   :  { %566 = dma.done.wait [#allocation5], 256  }
 0x4c8   :  { %567 = vsyncadd [#allocation5], 4294967040 }
 0x4c9   :  { %463 = vsyncpa [#allocation3], 1 }
 0x4ca   :  { %464 = vsyncpa [#allocation5], 1 }

</bundles_post_ra>
